<compile_context>
chip_gen: v5e
topology: v5e:2x2
jax: 0.10.0
libtpu: 0.0.40
codegen_flags: <defaults>
</compile_context>

<pallas_src>
import jax
import jax.numpy as jnp
from jax.experimental import pallas as pl
from jax.experimental.pallas import tpu as pltpu


# --------------------------------------------------------------------------- #
# Kernel
# --------------------------------------------------------------------------- #
def temporal_reduce_kernel(w_ref, b_ref, x_ref, o_ref):
    """One grid point = one (bc_tile x tile_hw) output slab.

    w_ref : VMEM (bc_tile, T)           per-row temporal weights (row = b*C + c)
    b_ref : VMEM (bc_tile, 1)           per-row bias
    x_ref : VMEM (bc_tile, T, tile_hw)  input slab
    o_ref : VMEM (bc_tile, tile_hw)     output slab
    """
    w = w_ref[...].astype(jnp.float32)                 # (bc_tile, T)
    b = b_ref[...].astype(jnp.float32)                 # (bc_tile, 1)
    x = x_ref[...].astype(jnp.float32)                 # (bc_tile, T, tile_hw)

    # Dense full-block load, VPU multiply, XLU sublane-reduction over T.
    acc = jnp.sum(w[:, :, None] * x, axis=1) + b       # (bc_tile, tile_hw)
    o_ref[...] = acc.astype(o_ref.dtype)


# --------------------------------------------------------------------------- #
# Tiling helpers
# --------------------------------------------------------------------------- #
def _round_up(n: int, m: int) -> int:
    return ((n + m - 1) // m) * m


def _min_sublanes(itemsize: int) -> int:
    # Packed dtypes pad the second-minor axis: f32 -> 8, bf16 -> 16, int8 -> 32.
    return {4: 8, 2: 16, 1: 32}.get(itemsize, 8)


def _x_block_budget_bytes() -> int:
    """Generation-aware x-block DMA size. Bigger blocks amortize the ~0.35 us
    per-grid-step overhead; v7x's 64 MiB physical VMEM is the binding cap."""
    try:
        vmem = getattr(pltpu.get_tpu_info(), "vmem_capacity_bytes", None)
    except Exception:
        vmem = None
    if vmem is None:
        vmem = 64 << 20                  # conservative (v7x-sized) fallback
    if vmem >= (128 << 20):              # v5e / v6e
        return 8 << 20
    return 7 << 20                       # v7x (64 MiB) or unknown smaller part


def _choose_tiles(bc: int, t: int, hw_pad: int, itemsize: int, budget: int):
    """Pick (bc_tile, tile_hw): lane-dense tiles whose x block fits `budget`.

    No divisibility requirement on HW — the cdiv grid masks the last block.
    """
    t_pad = _round_up(t, _min_sublanes(itemsize))      # sublane-padded T extent
    bytes_per_lane_row = t_pad * itemsize

    # Preferred path: keep the full fused B*C row extent and tile over HW.
    max_lanes = (budget // max(1, bc * bytes_per_lane_row)) // 128 * 128
    if max_lanes >= 128:
        return bc, min(hw_pad, max_lanes)

    # Fallback (very large B*C): lane-dense HW tile, tile B*C in sublane steps.
    tile_hw = min(hw_pad, 512)
    max_rows = budget // (tile_hw * bytes_per_lane_row)
    bc_tile = min(bc, max(8, (max_rows // 8) * 8))
    return bc_tile, tile_hw


# --------------------------------------------------------------------------- #
# Wrapper
# --------------------------------------------------------------------------- #
def temporal_reducer(x, weight, bias):
    """Pallas implementation of TemporalReducer.forward.

    x:      (B, C, T, H, W)   NCDHW, like the PyTorch Conv3d input
    weight: (C, 1, T, 1, 1)   PyTorch grouped-Conv3d weight layout
    bias:   (C,)
    returns (B, C, H, W)
    """
    B, C, T, H, W = x.shape
    BC, HW = B * C, H * W
    itemsize = jnp.dtype(x.dtype).itemsize

    # Free reshape: W (and H*W) is contiguous in NCDHW.
    x3 = x.reshape(BC, T, HW)

    # Lane-dense spatial axis: pad H*W to a multiple of 128 so every store is
    # an unmasked vst (the biggest single lever for a store-bound tail).
    HW_pad = _round_up(HW, 128)
    if HW_pad != HW:
        x3 = jnp.pad(x3, ((0, 0), (0, 0), (0, HW_pad - HW)))

    # Per-row weights / bias: row b*C + c uses channel c. Tiny, built once.
    w2d = weight.reshape(C, T).astype(jnp.float32)
    w_full = jnp.tile(w2d, (B, 1))                                   # (BC, T)
    b_full = jnp.tile(bias.astype(jnp.float32), (B,)).reshape(BC, 1)  # (BC, 1)

    budget = _x_block_budget_bytes()
    bc_tile, tile_hw = _choose_tiles(BC, T, HW_pad, itemsize, budget)

    # v7x has 2 TensorCores: make sure at least one 'parallel' axis has >=2
    # grid steps when the problem is big enough to care.
    x_total_bytes = BC * T * HW_pad * itemsize
    if (pl.cdiv(BC, bc_tile) * pl.cdiv(HW_pad, tile_hw) < 2
            and x_total_bytes > (4 << 20)):
        if HW_pad >= 256:
            tile_hw = max(128, _round_up(pl.cdiv(HW_pad, 2), 128))
        elif BC >= 16:
            bc_tile = _round_up(pl.cdiv(BC, 2), 8)

    grid = (pl.cdiv(BC, bc_tile), pl.cdiv(HW_pad, tile_hw))

    # Explicit VMEM limit: double-buffered blocks plus slack, accounting for
    # sublane/lane padding of each block.
    t_pad = _round_up(T, _min_sublanes(itemsize))
    bc_tile_pad = _round_up(bc_tile, 8)
    x_block_bytes = bc_tile * t_pad * tile_hw * itemsize
    out_block_bytes = bc_tile_pad * tile_hw * itemsize
    w_block_bytes = bc_tile_pad * _round_up(T, 128) * 4
    b_block_bytes = bc_tile_pad * 128 * 4
    resident = 2 * (x_block_bytes + out_block_bytes + w_block_bytes + b_block_bytes)
    vmem_limit = min(max(resident + (2 << 20), 16 << 20), 128 << 20)

    cost = pl.CostEstimate(
        flops=2 * BC * T * HW,
        transcendentals=0,
        bytes_accessed=(BC * T * HW_pad + BC * HW_pad) * itemsize
                       + (BC * T + BC) * 4,
    )

    out2d = pl.pallas_call(
        temporal_reduce_kernel,
        out_shape=jax.ShapeDtypeStruct((BC, HW_pad), x.dtype),
        grid=grid,
        in_specs=[
            pl.BlockSpec((bc_tile, T), lambda i, j: (i, 0)),              # weights
            pl.BlockSpec((bc_tile, 1), lambda i, j: (i, 0)),              # bias
            pl.BlockSpec((bc_tile, T, tile_hw), lambda i, j: (i, 0, j)),  # x
        ],
        out_specs=pl.BlockSpec((bc_tile, tile_hw), lambda i, j: (i, j)),
        compiler_params=pltpu.CompilerParams(
            dimension_semantics=("parallel", "parallel"),
            vmem_limit_bytes=int(vmem_limit),
        ),
        cost_estimate=cost,
    )(w_full, b_full, x3)

    if HW_pad != HW:
        out2d = out2d[:, :HW]
    return out2d.reshape(B, C, H, W)


# --------------------------------------------------------------------------- #
# Pure-JAX reference (matches PyTorch grouped Conv3d + squeeze(2))
# --------------------------------------------------------------------------- #
def temporal_reducer_ref(x, weight, bias):
    C, _, T, _, _ = weight.shape
    w2d = weight.reshape(C, T)
    out = jnp.einsum("bcthw,ct->bchw", x, w2d)
    return out + bias[None, :, None, None]


if __name__ == "__main__":
    # Module hyperparameters (defaults of TemporalReducer).
    in_channels = 3
    out_channels = 3
    time_dim = 8

    # Small deterministic shapes: batch=2, channels=3, time=8, spatial=16x16.
    B, C, T, H, W = 2, in_channels, time_dim, 16, 16

    key = jax.random.PRNGKey(0)
    kx, kw, kb = jax.random.split(key, 3)

    x = jax.random.normal(kx, (B, C, T, H, W), dtype=jnp.float32)
    # PyTorch Conv3d(groups=3) weight shape: (out, in/groups, kT, kH, kW)
    weight = jax.random.normal(kw, (out_channels, 1, time_dim, 1, 1),
                               dtype=jnp.float32) * 0.1
    bias = jax.random.normal(kb, (out_channels,), dtype=jnp.float32) * 0.1

    out = jax.block_until_ready(temporal_reducer(x, weight, bias))
    ref = jax.block_until_ready(temporal_reducer_ref(x, weight, bias))

    assert out.shape == (B, C, H, W), out.shape
    assert jnp.allclose(out, ref, atol=1e-5, rtol=1e-5), "mismatch vs reference"

    # Extra check at a shape where H*W is not a multiple of 128 and HW padding
    # plus partial-block masking is exercised.
    B2, H2, W2 = 3, 10, 13
    x2 = jax.random.normal(kx, (B2, C, T, H2, W2), dtype=jnp.float32)
    out2 = jax.block_until_ready(temporal_reducer(x2, weight, bias))
    ref2 = jax.block_until_ready(temporal_reducer_ref(x2, weight, bias))
    assert out2.shape == (B2, C, H2, W2), out2.shape
    assert jnp.allclose(out2, ref2, atol=1e-5, rtol=1e-5), "mismatch (padded HW)"

    print("KERNEL_OK")
</pallas_src>

<mosaic_0001>
module attributes {stable_mosaic.version = 11 : i64} {
  func.func @temporal_reduce_kernel(%arg0: i32, %arg1: i32, %arg2: memref<6x8xf32, #tpu.memory_space<vmem>>, %arg3: memref<6x1xf32, #tpu.memory_space<vmem>>, %arg4: memref<6x8x256xf32, #tpu.memory_space<vmem>>, %arg5: memref<6x256xf32, #tpu.memory_space<vmem>>) attributes {dimension_semantics = [#tpu.dimension_semantics<parallel>, #tpu.dimension_semantics<parallel>], iteration_bounds = array<i64: 1, 1>, scalar_prefetch = 0 : i64, scratch_operands = 0 : i64, tpu.core_type = #tpu.core_type<tc>, window_params = [{transform_indices = @transform_0, window_bounds = array<i64: 6, 8>}, {transform_indices = @transform_1, window_bounds = array<i64: 6, 1>}, {transform_indices = @transform_2, window_bounds = array<i64: 6, 8, 256>}, {transform_indices = @transform_3, window_bounds = array<i64: 6, 256>}]} {
    %c0 = arith.constant 0 : index
    %c0_0 = arith.constant 0 : index
    %0 = vector.load %arg2[%c0, %c0_0] : memref<6x8xf32, #tpu.memory_space<vmem>>, vector<6x8xf32>
    %c0_1 = arith.constant 0 : index
    %c0_2 = arith.constant 0 : index
    %1 = vector.load %arg3[%c0_1, %c0_2] : memref<6x1xf32, #tpu.memory_space<vmem>>, vector<6x1xf32>
    %c0_3 = arith.constant 0 : index
    %c0_4 = arith.constant 0 : index
    %c0_5 = arith.constant 0 : index
    %2 = vector.load %arg4[%c0_3, %c0_4, %c0_5] : memref<6x8x256xf32, #tpu.memory_space<vmem>>, vector<6x8x256xf32>
    %3 = vector.shape_cast %0 : vector<6x8xf32> to vector<6x8x1xf32>
    %4 = vector.broadcast %3 : vector<6x8x1xf32> to vector<6x8x256xf32>
    %5 = arith.mulf %4, %2 : vector<6x8x256xf32>
    %cst = arith.constant dense<0.000000e+00> : vector<6x256xf32>
    %6 = vector.multi_reduction <add>, %5, %cst [1] : vector<6x8x256xf32> to vector<6x256xf32>
    %7 = vector.broadcast %1 : vector<6x1xf32> to vector<6x256xf32>
    %8 = arith.addf %6, %7 : vector<6x256xf32>
    %c0_6 = arith.constant 0 : index
    %c0_7 = arith.constant 0 : index
    %9 = vector.load %arg5[%c0_6, %c0_7] : memref<6x256xf32, #tpu.memory_space<vmem>>, vector<6x256xf32>
    tpu.vector_store %arg5[%c0_6, %c0_7], %8 {strides = array<i32>} : memref<6x256xf32, #tpu.memory_space<vmem>>, vector<6x256xf32>,
    return
  }
  func.func @transform_0(%arg0: i32, %arg1: i32) -> (i32, i32) {
    %c0_i32 = arith.constant 0 : i32
    %c0_i32_0 = arith.constant 0 : i32
    return %arg0, %c0_i32 : i32, i32
  }
  func.func @transform_1(%arg0: i32, %arg1: i32) -> (i32, i32) {
    %c0_i32 = arith.constant 0 : i32
    %c0_i32_0 = arith.constant 0 : i32
    return %arg0, %c0_i32 : i32, i32
  }
  func.func @transform_2(%arg0: i32, %arg1: i32) -> (i32, i32, i32) {
    %c0_i32 = arith.constant 0 : i32
    %c0_i32_0 = arith.constant 0 : i32
    return %arg0, %c0_i32, %arg1 : i32, i32, i32
  }
  func.func @transform_3(%arg0: i32, %arg1: i32) -> (i32, i32) {
    %c0_i32 = arith.constant 0 : i32
    return %arg0, %arg1 : i32, i32
  }
}

</mosaic_0001>

<bundles_post_ra>
// kernel: tpu_custom_call.1
= control target key start
LH: loop header
LB: loop body
LE: loop exit
PB: predicated region body
PF: predicated region fallthrough
CT: control target
= control target key end

     0   :  { %8 = vsyncpa [#allocation3], 0  ;;  %s362_s0 = inlined_call_operand.vmem [shape: f32[6,8], index: 0, kind: input, shape index: {}]   ;;  %s363_s1 = inlined_call_operand.vmem [shape: f32[6,1], index: 1, kind: input, shape index: {}]   ;;  %s364_s2 = inlined_call_operand.hbm [shape: f32[6,8,256], index: 2, kind: input, shape index: {}]   ;;  %s365_s3 = inlined_call_operand.hbm [shape: f32[6,256], index: 3, kind: output, shape index: {}]  }
   0x1   :  { %9 = vsyncpa [#allocation4], 0  ;;  %s18_s14 = sshll.u32 %s364_s2, 4  ;;  %s317_s15 = smov [#allocation2]   ;;  %s19_s14 = int_to_ptr.hbm [resolvable:$true] %s18_s14 }
   0x2   :  { %s20_s16 = sshll.u32 %s317_s15, 4  ;;  %s318_s17 = smov 256   ;;  %s21_s16 = int_to_ptr.vmem [resolvable:$true] %s20_s16 }
   0x3   :  { %s319_s18 = smov 16  }
   0x4   :  { %26 = dma.hbm_to_vmem [thread:$0]  %s19_s14, 1536, %s21_s16, [#allocation3], %s318_s17, %s318_s17, %s319_s18  }
   0x5   :  { %313 = dma.done.wait [#allocation3], 1536  }
   0x6   :  { %314 = vsyncadd [#allocation3], 4294965760  ;;  %v46_v0 = vlaneseq  ;;  %v31_v2 = vld [vmem:[%s362_s0] sm:$0x3f]  ;;  %v320_v10 = vmov 0   ;;  %v42_v13 = vld [vmem:[#allocation2 + $0x48] sm:$0xff] }
   0x7   :  { %v52_v3 = vperm.slane %v31_v2, 1  ;;  %v45_v4 = vperm.slane %v31_v2, 0  ;;  %v73_v5 = vperm.slane %v31_v2, 4  ;;  %v59_v6 = vperm.slane %v31_v2, 2  ;;  %v32_v9 = vld [vmem:[%s363_s1] sm:$0x3f] }
   0x8   :  { %v47_v1 = vshrl.u32 %v46_v0, 7  ;;  %v66_v7 = vperm.slane %v31_v2, 3  ;;  %v80_v8 = vperm.slane %v31_v2, 5  ;;  %v41_v12 = vld [vmem:[#allocation2 + $0x40] sm:$0xff]  ;;  %v43_v14 = vld [vmem:[#allocation2 + $0x50] sm:$0xff]  ;;  %v44_v15 = vld [vmem:[#allocation2 + $0x58] sm:$0xff] }
   0x9   :  { %v35_v25 = vld [vmem:[#allocation2 + $0x10] sm:$0xff]  ;;  %v36_v30 = vld [vmem:[#allocation2 + $0x18] sm:$0xff]  ;;  %v33_v31 = vld [vmem:[#allocation2] sm:$0xff]  ;;  %vm211_vm0 = vcmask 1041409   ;;  %vm214_vm1 = vcmask 1042434   ;;  %vm217_vm2 = vcmask 1043459  }
   0xa   :  { %262 = vset.pattern.permute.xlu1 %v47_v1  ;;  %261 = vset.pattern.permute.xlu0 %v47_v1  ;;  %v34_v32 = vld [vmem:[#allocation2 + $0x8] sm:$0xff]  ;;  %v37_v54 = vld [vmem:[#allocation2 + $0x20] sm:$0xff]  ;;  %v39_v60 = vld [vmem:[#allocation2 + $0x30] sm:$0xff]  ;;  %vm220_vm3 = vcmask 1044484   ;;  %vm223_vm4 = vcmask 1045509   ;;  %s321_s0 = smov [#allocation5]  }
   0xb   :  { %263 = vset.pattern.permute.xlu2 %v47_v1  ;;  %v38_v59 = vld [vmem:[#allocation2 + $0x28] sm:$0xff]  ;;  %v40_v61 = vld [vmem:[#allocation2 + $0x38] sm:$0xff]  ;;  %s244_s1 = sshll.u32 %s321_s0, 4  ;;  %s246_s24 = sshll.u32 %s365_s3, 4  ;;  %s245_s1 = int_to_ptr.vmem [resolvable:$true] %s244_s1  ;;  %s247_s24 = int_to_ptr.hbm [resolvable:$true] %s246_s24 }
  0x12   :  { %57 = vperm.xlu0 %261, %v52_v3   ;;  %50 = vperm.xlu1 %262, %v45_v4  }
  0x13   :  { %78 = vperm.xlu2 %263, %v73_v5  }
  0x1a   :  { %64 = vperm.xlu0 %261, %v59_v6   ;;  %71 = vperm.xlu1 %262, %v66_v7  }
  0x1b   :  { %85 = vperm.xlu2 %263, %v80_v8  }
  0x22   :  { %264 = vset.pattern.permute.xlu0 %v320_v10 }
  0x23   :  { %173 = vperm.xlu0 %264, %v32_v9  }
  0x6d   :  { %v79_v11 = vpop.permute.xlu2 %78 }
  0x6e   :  { %v95_v17 = vmul.f32 %v79_v11, %v41_v12  ;;  %v96_v18 = vmul.f32 %v79_v11, %v42_v13 }
  0x70   :  { %v147_v21 = vrot.slane %v95_v17, 4  ;;  %v153_v22 = vrot.slane %v96_v18, 4 }
  0x72   :  { %v148_v26 = vadd.f32 %v147_v21, %v95_v17  ;;  %v154_v27 = vadd.f32 %v153_v22, %v96_v18 }
  0x74   :  { %v149_v39 = vrot.slane %v148_v26, 2  ;;  %v155_v40 = vrot.slane %v154_v27, 2 }
  0x75   :  { %v86_v16 = vpop.permute.xlu2 %85 }
  0x76   :  { %v97_v19 = vmul.f32 %v86_v16, %v43_v14  ;;  %v98_v20 = vmul.f32 %v86_v16, %v44_v15  ;;  %v150_v51 = vadd.f32 %v149_v39, %v148_v26  ;;  %v156_v52 = vadd.f32 %v155_v40, %v154_v27 }
  0x78   :  { %v159_v23 = vrot.slane %v97_v19, 4  ;;  %v165_v24 = vrot.slane %v98_v20, 4  ;;  %v151_v8 = vrot.slane %v150_v51, 1  ;;  %v157_v9 = vrot.slane %v156_v52, 1 }
  0x7a   :  { %v160_v28 = vadd.f32 %v159_v23, %v97_v19  ;;  %v166_v29 = vadd.f32 %v165_v24, %v98_v20  ;;  %v152_v24 = vadd.f32 %v151_v8, %v150_v51 }
  0x7c   :  { %v161_v41 = vrot.slane %v160_v28, 2  ;;  %v167_v42 = vrot.slane %v166_v29, 2 }
  0x7e   :  { %v162_v53 = vadd.f32 %v161_v41, %v160_v28  ;;  %v168_v55 = vadd.f32 %v167_v42, %v166_v29 }
  0x80   :  { %v163_v10 = vrot.slane %v162_v53, 1  ;;  %v169_v11 = vrot.slane %v168_v55, 1 }
  0x82   :  { %v164_v26 = vadd.f32 %v163_v10, %v162_v53  ;;  %v170_v27 = vadd.f32 %v169_v11, %v168_v55 }
  0x84   :  { %v58_v33 = vpop.permute.xlu0 %57  ;;  %v51_v34 = vpop.permute.xlu1 %50 }
  0x85   :  { %v89_v35 = vmul.f32 %v58_v33, %v35_v25  ;;  %v90_v36 = vmul.f32 %v58_v33, %v36_v30  ;;  %v87_v37 = vmul.f32 %v51_v34, %v33_v31  ;;  %v88_v38 = vmul.f32 %v51_v34, %v34_v32 }
  0x86   :  { %v158_v25 = vadd.f32 %v157_v9, %v156_v52 }
  0x87   :  { %v111_v43 = vrot.slane %v89_v35, 4  ;;  %v117_v44 = vrot.slane %v90_v36, 4  ;;  %v99_v45 = vrot.slane %v87_v37, 4  ;;  %v105_v46 = vrot.slane %v88_v38, 4 }
  0x89   :  { %v112_v47 = vadd.f32 %v111_v43, %v89_v35  ;;  %v118_v48 = vadd.f32 %v117_v44, %v90_v36  ;;  %v100_v49 = vadd.f32 %v99_v45, %v87_v37  ;;  %v106_v50 = vadd.f32 %v105_v46, %v88_v38 }
  0x8b   :  { %v113_v56 = vrot.slane %v112_v47, 2  ;;  %v119_v57 = vrot.slane %v118_v48, 2  ;;  %v101_v58 = vrot.slane %v100_v49, 2  ;;  %v107_v3 = vrot.slane %v106_v50, 2 }
  0x8c   :  { %v65_v62 = vpop.permute.xlu0 %64  ;;  %v72_v63 = vpop.permute.xlu1 %71 }
  0x8d   :  { %v114_v0 = vadd.f32 %v113_v56, %v112_v47  ;;  %v120_v1 = vadd.f32 %v119_v57, %v118_v48  ;;  %v102_v2 = vadd.f32 %v101_v58, %v100_v49  ;;  %v91_v4 = vmul.f32 %v65_v62, %v37_v54 }
  0x8e   :  { %v92_v5 = vmul.f32 %v65_v62, %v38_v59  ;;  %v93_v6 = vmul.f32 %v72_v63, %v39_v60  ;;  %v94_v7 = vmul.f32 %v72_v63, %v40_v61  ;;  %v108_v19 = vadd.f32 %v107_v3, %v106_v50 }
  0x8f   :  { %v123_v12 = vrot.slane %v91_v4, 4  ;;  %v115_v16 = vrot.slane %v114_v0, 1  ;;  %v121_v17 = vrot.slane %v120_v1, 1  ;;  %v103_v18 = vrot.slane %v102_v2, 1 }
  0x90   :  { %v129_v13 = vrot.slane %v92_v5, 4  ;;  %v135_v14 = vrot.slane %v93_v6, 4  ;;  %v141_v15 = vrot.slane %v94_v7, 4  ;;  %v109_v35 = vrot.slane %v108_v19, 1 }
  0x91   :  { %v124_v20 = vadd.f32 %v123_v12, %v91_v4  ;;  %v116_v32 = vadd.f32 %v115_v16, %v114_v0  ;;  %v122_v33 = vadd.f32 %v121_v17, %v120_v1  ;;  %v104_v34 = vadd.f32 %v103_v18, %v102_v2 }
  0x92   :  { %v130_v21 = vadd.f32 %v129_v13, %v92_v5  ;;  %v136_v22 = vadd.f32 %v135_v14, %v93_v6  ;;  %v142_v23 = vadd.f32 %v141_v15, %v94_v7  ;;  %v110_v49 = vadd.f32 %v109_v35, %v108_v19 }
  0x93   :  { %v125_v28 = vrot.slane %v124_v20, 2 }
  0x94   :  { %v131_v29 = vrot.slane %v130_v21, 2  ;;  %v137_v30 = vrot.slane %v136_v22, 2  ;;  %v143_v31 = vrot.slane %v142_v23, 2 }
  0x95   :  { %v174_v36 = vpop.permute.xlu0 %173  ;;  %v126_v37 = vadd.f32 %v125_v28, %v124_v20 }
  0x96   :  { %v132_v38 = vadd.f32 %v131_v29, %v130_v21  ;;  %v138_v39 = vadd.f32 %v137_v30, %v136_v22  ;;  %v144_v40 = vadd.f32 %v143_v31, %v142_v23  ;;  %v175_v41 = vrot.slane %v174_v36, 1 }
  0x97   :  { %v176_v42 = vrot.slane %v174_v36, 2  ;;  %v177_v43 = vrot.slane %v174_v36, 3  ;;  %v178_v44 = vrot.slane %v174_v36, 4  ;;  %v127_v45 = vrot.slane %v126_v37, 1 }
  0x98   :  { %v133_v46 = vrot.slane %v132_v38, 1  ;;  %v139_v47 = vrot.slane %v138_v39, 1  ;;  %v145_v48 = vrot.slane %v144_v40, 1  ;;  %v179_v50 = vrot.slane %v174_v36, 5 }
  0x99   :  { %v186_v51 = vadd.f32 %v174_v36, %v104_v34  ;;  %v188_v52 = vadd.f32 %v175_v41, %v116_v32  ;;  %v128_v53 = vadd.f32 %v127_v45, %v126_v37  ;;  %v189_v57 = vadd.f32 %v175_v41, %v122_v33 }
  0x9a   :  { %v134_v54 = vadd.f32 %v133_v46, %v132_v38  ;;  %v140_v55 = vadd.f32 %v139_v47, %v138_v39  ;;  %v146_v56 = vadd.f32 %v145_v48, %v144_v40  ;;  %v194_v58 = vadd.f32 %v178_v44, %v152_v24 }
  0x9b   :  { %v195_v59 = vadd.f32 %v178_v44, %v158_v25  ;;  %v210_v60 = vrot.slane %v188_v52, 7  ;;  %v190_v61 = vadd.f32 %v176_v42, %v128_v53  ;;  %v187_v1 = vadd.f32 %v174_v36, %v110_v49 }
  0x9c   :  { %v191_v62 = vadd.f32 %v176_v42, %v134_v54  ;;  %v192_v63 = vadd.f32 %v177_v43, %v140_v55  ;;  %v193_v0 = vadd.f32 %v177_v43, %v146_v56  ;;  %v225_v2 = vrot.slane %v189_v57, 7 }
  0x9d   :  { %v196_v3 = vadd.f32 %v179_v50, %v164_v26  ;;  %v197_v4 = vadd.f32 %v179_v50, %v170_v27  ;;  %v213_v5 = vrot.slane %v190_v61, 6  ;;  %v212_v9 = vsel %vm211_vm0, %v210_v60, %v186_v51 }
  0x9e   :  { %v216_v6 = vrot.slane %v192_v63, 5  ;;  %v227_v7 = vrot.slane %v191_v62, 6  ;;  %v229_v8 = vrot.slane %v193_v0, 5  ;;  %v226_v10 = vsel %vm211_vm0, %v225_v2, %v187_v1 }
  0x9f   :  { %v215_v11 = vsel %vm214_vm1, %v213_v5, %v212_v9  ;;  %v219_v12 = vrot.slane %v194_v58, 4  ;;  %v231_v14 = vrot.slane %v195_v59, 4  ;;  %v222_v16 = vrot.slane %v196_v3, 3 }
  0xa0   :  { %v228_v13 = vsel %vm214_vm1, %v227_v7, %v226_v10  ;;  %v218_v15 = vsel %vm217_vm2, %v216_v6, %v215_v11  ;;  %v233_v18 = vrot.slane %v197_v4, 3 }
  0xa1   :  { %v230_v17 = vsel %vm217_vm2, %v229_v8, %v228_v13  ;;  %v221_v19 = vsel %vm220_vm3, %v219_v12, %v218_v15 }
  0xa2   :  { %v232_v20 = vsel %vm220_vm3, %v231_v14, %v230_v17  ;;  %v224_v21 = vsel %vm223_vm4, %v222_v16, %v221_v19 }
  0xa3   :  { %v234_v22 = vsel %vm223_vm4, %v233_v18, %v232_v20  ;;  %237 = vst [vmem:[#allocation5] sm:$0x3f] %v224_v21 }
  0xa4   :  { %238 = vst [vmem:[#allocation5 + $0x8] sm:$0x3f] %v234_v22 }
  0xa5   :  { %249 = dma.vmem_to_hbm [thread:$0]  %s245_s1, 256, %s247_s24, [#allocation4]  }
  0xa6   :  { %315 = dma.done.wait [#allocation4], 256  }
  0xa7   :  { %316 = vsyncadd [#allocation4], 4294967040 }
  0xa8   :  { %254 = vsyncpa [#allocation3], 1 }
  0xa9   :  { %255 = vsyncpa [#allocation4], 1 }

</bundles_post_ra>
